<compile_context>
chip_gen: v5e
topology: v5e:2x2
jax: 0.10.0
libtpu: 0.0.40
codegen_flags: <defaults>
</compile_context>

<pallas_src>
import functools

import jax
import jax.numpy as jnp
from jax.experimental import pallas as pl
from jax.experimental.pallas import tpu as pltpu


def _cdiv(a, b):
    return (a + b - 1) // b


def _round_up(x, m):
    return _cdiv(x, m) * m


def _vmem_budget_bytes():
    """Per-core VMEM budget, safe on v5e/v6e (128 MiB) and v7x (64 MiB)."""
    try:
        cap = int(pltpu.get_tpu_info().vmem_capacity_bytes)
    except Exception:
        cap = 64 << 20                      # conservative: v7x per-TC VMEM
    return int(min(max(cap - (8 << 20), 16 << 20), 100 << 20))


def _choose_tiles(B, V, H, O_pad, w_bytes, out_bytes, budget, tm_max=512):
    """Pick (tm, B_pad, tk, V_pad) under the VMEM budget."""
    x_bytes = 4                              # budget x conservatively as f32
    B_pad0 = _round_up(B, 8)
    if B_pad0 <= 8:
        tm = B_pad0
    else:
        # >= 2 batch tiles so the "parallel" axis feeds both v7x TensorCores.
        n_tiles = max(2, _cdiv(B_pad0, tm_max))
        tm = _round_up(_cdiv(B_pad0, n_tiles), 8)

    def need(tm_, tk_):
        fixed = tm_ * H * 4                                      # f32 accumulator
        fixed += 2 * (H * 4 + H * O_pad * w_bytes + O_pad * 4)   # b1 / w2 / b2
        fixed += 2 * tm_ * O_pad * out_bytes                     # output block
        return fixed + 2 * tm_ * tk_ * x_bytes + 2 * tk_ * H * w_bytes

    # If even the smallest streaming config does not fit, shrink the batch tile.
    tk_min = min(V, 256)
    while tm > 8 and need(tm, tk_min) > budget:
        tm = _round_up(tm // 2, 8)
    B_pad = _round_up(B_pad0, tm)

    # Prefer w1 fully resident: single reduction step, no vocab padding, w1 is
    # DMA'd from HBM exactly once for the whole call (constant block index).
    if need(tm, V) <= budget:
        return tm, B_pad, V, V

    # Otherwise stream w1 in (tk, H) slabs; tk a multiple of 256 (256-wide MXU).
    tk = 256
    while tk + 256 < V and need(tm, tk + 256) <= budget:
        tk += 256
    return tm, B_pad, tk, _round_up(V, tk)


def _nn_kernel(x_ref, w1_ref, b1_ref, w2_ref, b2_ref, o_ref, acc_ref,
               *, compute_dtype):
    k = pl.program_id(1)
    nk = pl.num_programs(1)

    # ---- init: fold the layer-1 bias into the f32 accumulator ----------------
    @pl.when(k == 0)
    def _():
        acc_ref[...] = jnp.broadcast_to(
            b1_ref[...].astype(jnp.float32), acc_ref.shape)

    # ---- layer-1 partial product: (tm, tk) @ (tk, H), f32 accumulate ---------
    # x/w1 arrive already in compute_dtype (bf16) except on the unpadded f32
    # streaming fallback, where the astype is the per-tile cast.
    acc_ref[...] += jnp.dot(
        x_ref[...].astype(compute_dtype),
        w1_ref[...],
        preferred_element_type=jnp.float32)

    # ---- finalize: ReLU + layer-2 (+ b2) once per output tile ----------------
    @pl.when(k == nk - 1)
    def _():
        h = jnp.maximum(acc_ref[...], 0.0)                 # f32 intermediate
        out = jnp.dot(h.astype(compute_dtype), w2_ref[...],
                      preferred_element_type=jnp.float32)  # bf16 MXU pass
        out = out + b2_ref[...].astype(jnp.float32)
        o_ref[...] = out.astype(o_ref.dtype)


def nn_forward(x, w1, b1, w2, b2, *, compute_dtype=jnp.bfloat16):
    """Fused forward pass of the NN module.

    x: (B, V) f32, w1: (V, H), b1: (1, H), w2: (H, 2), b2: (1, 2)
    returns (B, 2) f32
    """
    B, V = x.shape
    V_w, H = w1.shape
    O = w2.shape[1]
    assert V_w == V
    b1 = b1.reshape(1, H).astype(jnp.float32)
    b2 = b2.reshape(1, O).astype(jnp.float32)

    is_bf16 = compute_dtype == jnp.bfloat16
    w_bytes = jnp.dtype(compute_dtype).itemsize
    O_pad = _round_up(max(O, 128), 128)                 # lane-dense output
    out_store_dtype = jnp.bfloat16 if is_bf16 else jnp.float32
    out_bytes = jnp.dtype(out_store_dtype).itemsize

    budget = _vmem_budget_bytes()
    tm, B_pad, tk, V_pad = _choose_tiles(B, V, H, O_pad, w_bytes, out_bytes,
                                         budget)

    # ---- operand prep (single fused pad/cast passes) --------------------------
    # w1: converted to the compute dtype once here (ideally the caller keeps the
    # persistent copy of w1 in bf16 so this conversion is amortized away).
    w1 = w1.astype(compute_dtype)
    if V_pad != V:
        w1 = jnp.pad(w1, ((0, V_pad - V), (0, 0)))
    # x: fold the bf16 cast into the padding pass; when no padding is needed the
    # kernel casts per tile instead (avoids an extra full HBM pass over x).
    if (B_pad, V_pad) != (B, V):
        x = jnp.pad(x.astype(compute_dtype),
                    ((0, B_pad - B), (0, V_pad - V)))
    # w2/b2: zero-pad O -> 128 lanes (unmasked stores); w2 in the compute dtype.
    w2 = w2.astype(compute_dtype)
    if O_pad != O:
        w2 = jnp.pad(w2, ((0, 0), (0, O_pad - O)))
        b2 = jnp.pad(b2, ((0, 0), (0, O_pad - O)))

    grid = (B_pad // tm, V_pad // tk)
    n_btiles, nk = grid

    # ---- VMEM limit from actual tile footprints --------------------------------
    x_bytes = jnp.dtype(x.dtype).itemsize
    vmem_need = (tm * H * 4
                 + 2 * (H * 4 + H * O_pad * w_bytes + O_pad * 4)
                 + 2 * tm * O_pad * out_bytes
                 + 2 * tm * tk * x_bytes + 2 * tk * H * w_bytes)
    vmem_limit = int(min(max(vmem_need + (4 << 20), 32 << 20), budget))

    # ---- advisory cost estimate: actual streamed bytes -------------------------
    w1_reads = 1 if nk == 1 else n_btiles   # resident => fetched exactly once
    cost = pl.CostEstimate(
        flops=2 * B_pad * V_pad * H + 2 * B_pad * H * O_pad,
        transcendentals=0,
        bytes_accessed=int(B_pad * V_pad * x_bytes
                           + w1_reads * V_pad * H * w_bytes
                           + H * 4 + H * O_pad * w_bytes + O_pad * 4
                           + B_pad * O_pad * out_bytes),
    )

    out = pl.pallas_call(
        functools.partial(_nn_kernel, compute_dtype=compute_dtype),
        out_shape=jax.ShapeDtypeStruct((B_pad, O_pad), out_store_dtype),
        grid_spec=pltpu.PrefetchScalarGridSpec(
            num_scalar_prefetch=0,
            grid=grid,
            in_specs=[
                pl.BlockSpec((tm, tk), lambda i, k: (i, k)),    # x tile
                pl.BlockSpec((tk, H), lambda i, k: (k, 0)),     # w1 (resident if nk==1)
                pl.BlockSpec((1, H), lambda i, k: (0, 0)),      # b1 (constant index)
                pl.BlockSpec((H, O_pad), lambda i, k: (0, 0)),  # w2 padded, bf16
                pl.BlockSpec((1, O_pad), lambda i, k: (0, 0)),  # b2 padded
            ],
            out_specs=pl.BlockSpec((tm, O_pad), lambda i, k: (i, 0)),
            scratch_shapes=[pltpu.VMEM((tm, H), jnp.float32)],
        ),
        compiler_params=pltpu.CompilerParams(
            dimension_semantics=("parallel", "arbitrary"),
            vmem_limit_bytes=vmem_limit,
        ),
        cost_estimate=cost,
    )(x, w1, b1, w2, b2)

    return out[:B, :O].astype(jnp.float32)


def init_params(key, vocab_size, hidden_size):
    """Deterministic init mimicking torch.nn.Linear's U(-1/sqrt(fan_in), ...)."""
    k1, k2, k3, k4 = jax.random.split(key, 4)
    bound1 = 1.0 / jnp.sqrt(vocab_size)
    bound2 = 1.0 / jnp.sqrt(hidden_size)
    w1 = jax.random.uniform(k1, (vocab_size, hidden_size), jnp.float32,
                            -bound1, bound1)
    b1 = jax.random.uniform(k2, (1, hidden_size), jnp.float32, -bound1, bound1)
    w2 = jax.random.uniform(k3, (hidden_size, 2), jnp.float32, -bound2, bound2)
    b2 = jax.random.uniform(k4, (1, 2), jnp.float32, -bound2, bound2)
    return w1, b1, w2, b2


if __name__ == "__main__":
    key = jax.random.PRNGKey(0)
    batch, vocab_size, hidden_size = 8, 32, 32

    kx, kp = jax.random.split(key)
    x = jax.random.normal(kx, (batch, vocab_size), jnp.float32)
    w1, b1, w2, b2 = init_params(kp, vocab_size, hidden_size)

    # Full-precision reference in plain JAX.
    h_ref = jnp.maximum(
        jax.lax.dot(x, w1, precision=jax.lax.Precision.HIGHEST) + b1, 0.0)
    ref = jax.lax.dot(h_ref, w2, precision=jax.lax.Precision.HIGHEST) + b2

    # f32 compute path: tight tolerance (exact-semantics check).
    out_f32 = jax.block_until_ready(
        nn_forward(x, w1, b1, w2, b2, compute_dtype=jnp.float32))
    assert out_f32.shape == (batch, 2)
    assert jnp.allclose(out_f32, ref, atol=1e-4, rtol=1e-4)

    # Default bf16-MXU path: bf16-level tolerance.
    out_bf16 = jax.block_until_ready(nn_forward(x, w1, b1, w2, b2))
    assert out_bf16.shape == (batch, 2)
    assert jnp.allclose(out_bf16, ref, atol=3e-2, rtol=3e-2)

    print("KERNEL_OK")
</pallas_src>

<mosaic_0001>
module attributes {stable_mosaic.version = 11 : i64} {
  func.func @_nn_kernel(%arg0: i32, %arg1: i32, %arg2: memref<8x32xf32, #tpu.memory_space<vmem>>, %arg3: memref<32x32xf32, #tpu.memory_space<vmem>>, %arg4: memref<1x32xf32, #tpu.memory_space<vmem>>, %arg5: memref<32x128xf32, #tpu.memory_space<vmem>>, %arg6: memref<1x128xf32, #tpu.memory_space<vmem>>, %arg7: memref<8x128xf32, #tpu.memory_space<vmem>>, %arg8: memref<8x32xf32, #tpu.memory_space<vmem>>) attributes {dimension_semantics = [#tpu.dimension_semantics<parallel>, #tpu.dimension_semantics<arbitrary>], iteration_bounds = array<i64: 1, 1>, scalar_prefetch = 0 : i64, scratch_operands = 1 : i64, tpu.core_type = #tpu.core_type<tc>, window_params = [{transform_indices = @transform_0, window_bounds = array<i64: 8, 32>}, {transform_indices = @transform_1, window_bounds = array<i64: 32, 32>}, {pipeline_mode = #tpu.pipeline_mode<synchronous>, transform_indices = @transform_2, window_bounds = array<i64: 1, 32>}, {pipeline_mode = #tpu.pipeline_mode<synchronous>, transform_indices = @transform_3, window_bounds = array<i64: 32, 128>}, {pipeline_mode = #tpu.pipeline_mode<synchronous>, transform_indices = @transform_4, window_bounds = array<i64: 1, 128>}, {transform_indices = @transform_5, window_bounds = array<i64: 8, 128>}]} {
    %c0_i32 = arith.constant 0 : i32
    %0 = arith.cmpi eq, %arg1, %c0_i32 : i32
    %1 = arith.extui %0 : i1 to i32
    %c0_i32_0 = arith.constant 0 : i32
    %2 = arith.cmpi ne, %1, %c0_i32_0 : i32
    scf.if %2 {
      %c0_10 = arith.constant 0 : index
      %c0_11 = arith.constant 0 : index
      %12 = vector.load %arg4[%c0_10, %c0_11] : memref<1x32xf32, #tpu.memory_space<vmem>>, vector<1x32xf32>
      %13 = vector.shape_cast %12 : vector<1x32xf32> to vector<1x32xf32>
      %14 = vector.broadcast %13 : vector<1x32xf32> to vector<8x32xf32>
      %c0_12 = arith.constant 0 : index
      %c0_13 = arith.constant 0 : index
      %15 = vector.load %arg8[%c0_12, %c0_13] : memref<8x32xf32, #tpu.memory_space<vmem>>, vector<8x32xf32>
      tpu.vector_store %arg8[%c0_12, %c0_13], %14 {strides = array<i32>} : memref<8x32xf32, #tpu.memory_space<vmem>>, vector<8x32xf32>,
    } else {
    }
    %c0 = arith.constant 0 : index
    %c0_1 = arith.constant 0 : index
    %3 = vector.load %arg8[%c0, %c0_1] : memref<8x32xf32, #tpu.memory_space<vmem>>, vector<8x32xf32>
    %c0_2 = arith.constant 0 : index
    %c0_3 = arith.constant 0 : index
    %4 = vector.load %arg2[%c0_2, %c0_3] : memref<8x32xf32, #tpu.memory_space<vmem>>, vector<8x32xf32>
    %c0_4 = arith.constant 0 : index
    %c0_5 = arith.constant 0 : index
    %5 = vector.load %arg3[%c0_4, %c0_5] : memref<32x32xf32, #tpu.memory_space<vmem>>, vector<32x32xf32>
    %cst = arith.constant dense<0.000000e+00> : vector<8x32xf32>
    %6 = tpu.matmul %4, %5, %cst {dimension_numbers = #tpu.dot_dimension_numbers<[1], [0], [0], [1], [0, 0, 1, 1], [], []>} : vector<8x32xf32>, vector<32x32xf32>, vector<8x32xf32> -> vector<8x32xf32>
    %7 = arith.addf %3, %6 : vector<8x32xf32>
    %c0_6 = arith.constant 0 : index
    %c0_7 = arith.constant 0 : index
    %8 = vector.load %arg8[%c0_6, %c0_7] : memref<8x32xf32, #tpu.memory_space<vmem>>, vector<8x32xf32>
    tpu.vector_store %arg8[%c0_6, %c0_7], %7 {strides = array<i32>} : memref<8x32xf32, #tpu.memory_space<vmem>>, vector<8x32xf32>,
    %c0_i32_8 = arith.constant 0 : i32
    %9 = arith.cmpi eq, %arg1, %c0_i32_8 : i32
    %10 = arith.extui %9 : i1 to i32
    %c0_i32_9 = arith.constant 0 : i32
    %11 = arith.cmpi ne, %10, %c0_i32_9 : i32
    scf.if %11 {
      %c0_10 = arith.constant 0 : index
      %c0_11 = arith.constant 0 : index
      %12 = vector.load %arg8[%c0_10, %c0_11] : memref<8x32xf32, #tpu.memory_space<vmem>>, vector<8x32xf32>
      %cst_12 = arith.constant 0.000000e+00 : f32
      %13 = vector.broadcast %cst_12 : f32 to vector<8x32xf32>
      %14 = arith.maximumf %12, %13 : vector<8x32xf32>
      %c0_13 = arith.constant 0 : index
      %c0_14 = arith.constant 0 : index
      %15 = vector.load %arg5[%c0_13, %c0_14] : memref<32x128xf32, #tpu.memory_space<vmem>>, vector<32x128xf32>
      %cst_15 = arith.constant dense<0.000000e+00> : vector<8x128xf32>
      %16 = tpu.matmul %14, %15, %cst_15 {dimension_numbers = #tpu.dot_dimension_numbers<[1], [0], [0], [1], [0, 0, 1, 1], [], []>} : vector<8x32xf32>, vector<32x128xf32>, vector<8x128xf32> -> vector<8x128xf32>
      %c0_16 = arith.constant 0 : index
      %c0_17 = arith.constant 0 : index
      %17 = vector.load %arg6[%c0_16, %c0_17] : memref<1x128xf32, #tpu.memory_space<vmem>>, vector<1x128xf32>
      %18 = vector.broadcast %17 : vector<1x128xf32> to vector<8x128xf32>
      %19 = arith.addf %16, %18 : vector<8x128xf32>
      %c0_18 = arith.constant 0 : index
      %c0_19 = arith.constant 0 : index
      %20 = vector.load %arg7[%c0_18, %c0_19] : memref<8x128xf32, #tpu.memory_space<vmem>>, vector<8x128xf32>
      tpu.vector_store %arg7[%c0_18, %c0_19], %19 {strides = array<i32>} : memref<8x128xf32, #tpu.memory_space<vmem>>, vector<8x128xf32>,
    } else {
    }
    return
  }
  func.func @transform_0(%arg0: i32, %arg1: i32) -> (i32, i32) {
    %c0_i32 = arith.constant 0 : i32
    return %arg0, %arg1 : i32, i32
  }
  func.func @transform_1(%arg0: i32, %arg1: i32) -> (i32, i32) {
    %c0_i32 = arith.constant 0 : i32
    %c0_i32_0 = arith.constant 0 : i32
    return %arg1, %c0_i32 : i32, i32
  }
  func.func @transform_2(%arg0: i32, %arg1: i32) -> (i32, i32) {
    %c0_i32 = arith.constant 0 : i32
    %c0_i32_0 = arith.constant 0 : i32
    %c0_i32_1 = arith.constant 0 : i32
    return %c0_i32, %c0_i32_0 : i32, i32
  }
  func.func @transform_3(%arg0: i32, %arg1: i32) -> (i32, i32) {
    %c0_i32 = arith.constant 0 : i32
    %c0_i32_0 = arith.constant 0 : i32
    %c0_i32_1 = arith.constant 0 : i32
    return %c0_i32, %c0_i32_0 : i32, i32
  }
  func.func @transform_4(%arg0: i32, %arg1: i32) -> (i32, i32) {
    %c0_i32 = arith.constant 0 : i32
    %c0_i32_0 = arith.constant 0 : i32
    %c0_i32_1 = arith.constant 0 : i32
    return %c0_i32, %c0_i32_0 : i32, i32
  }
  func.func @transform_5(%arg0: i32, %arg1: i32) -> (i32, i32) {
    %c0_i32 = arith.constant 0 : i32
    %c0_i32_0 = arith.constant 0 : i32
    return %arg0, %c0_i32 : i32, i32
  }
}

</mosaic_0001>

<bundles_post_ra>
// kernel: tpu_custom_call.1
= control target key start
LH: loop header
LB: loop body
LE: loop exit
PB: predicated region body
PF: predicated region fallthrough
CT: control target
= control target key end

     0   :  { %10 = vsyncpa [#allocation4], 0  ;;  %s333_s0 = inlined_call_operand.hbm [shape: f32[8,32], index: 0, kind: input, shape index: {}]   ;;  %s334_s1 = inlined_call_operand.hbm [shape: f32[32,32], index: 1, kind: input, shape index: {}]   ;;  %s335_s2 = inlined_call_operand.vmem [shape: f32[1,32], index: 2, kind: input, shape index: {}]   ;;  %s336_s3 = inlined_call_operand.hbm [shape: f32[32,128], index: 3, kind: input, shape index: {}]   ;;  %s337_s4 = inlined_call_operand.vmem [shape: f32[1,128], index: 4, kind: input, shape index: {}]   ;;  %s338_s5 = inlined_call_operand.hbm [shape: f32[8,128], index: 5, kind: output, shape index: {}]  }
   0x1   :  { %11 = vsyncpa [#allocation7], 0  ;;  %s28_s20 = sshll.u32 %s334_s1, 4  ;;  %s29_s20 = int_to_ptr.hbm [resolvable:$true] %s28_s20 }
   0x2   :  { %12 = vsyncpa [#allocation5], 0  ;;  %s275_s21 = smov [#allocation6]   ;;  %s18_s25 = sshll.u32 %s333_s0, 4  ;;  %s19_s25 = int_to_ptr.hbm [resolvable:$true] %s18_s25 }
   0x3   :  { %s30_s22 = sshll.u32 %s275_s21, 4  ;;  %s276_s26 = smov 128   ;;  %s31_s22 = int_to_ptr.vmem [resolvable:$true] %s30_s22 }
   0x4   :  { %s277_s27 = smov 8   ;;  %s278_s28 = smov [#allocation3]  }
   0x5   :  { %36 = dma.hbm_to_vmem [thread:$0]  %s29_s20, 512, %s31_s22, [#allocation7], %s276_s26, %s276_s26, %s277_s27  }
   0x6   :  { %s20_s29 = sshll.u32 %s278_s28, 4  ;;  %s43_s7 = sshll.u32 %s336_s3, 4  ;;  %s21_s29 = int_to_ptr.vmem [resolvable:$true] %s20_s29  ;;  %s44_s7 = int_to_ptr.hbm [resolvable:$true] %s43_s7 }
   0x7   :  { %23 = dma.hbm_to_vmem [thread:$0]  %s19_s25, 128, %s21_s29, [#allocation4]  }
   0x8   :  { %s279_s1 = smov [#allocation8]  }
   0x9   :  { %s45_s8 = sshll.u32 %s279_s1, 4  ;;  %s46_s8 = int_to_ptr.vmem [resolvable:$true] %s45_s8 }
   0xa   :  { %51 = dma.hbm_to_vmem [thread:$0]  %s44_s7, 512, %s46_s8, [#allocation7], %s276_s26, %s276_s26, %s277_s27  }
   0xb   :  { %269 = dma.done.wait [#allocation4], 128  }
   0xc   :  { %270 = vsyncadd [#allocation4], 4294967168 }
   0xd   :  { %271 = dma.done.wait [#allocation7], 1024  }
   0xe   :  { %272 = vsyncadd [#allocation7], 4294966272  ;;  %v81_v0 = vld [vmem:[#allocation6 + $0x18] sm:$0xff]  ;;  %v80_v1 = vld [vmem:[#allocation6 + $0x10] sm:$0xff]  ;;  %vm74_vm0 = vcmask 261120   ;;  %s280_s10 = smov [#allocation9]  }
   0xf   :  { %98 = vmatpush.msra.mxu0 %v81_v0  ;;  %v171_v2 = vld [vmem:[%s335_s2] ss:$0 sm:$0xff]  ;;  %v79_v3 = vld [vmem:[#allocation6 + $0x8] sm:$0xff]  ;;  %v78_v4 = vld [vmem:[#allocation6] sm:$0xff]  ;;  %s150_s11 = sshll.u32 %s280_s10, 4  ;;  %s152_s14 = sshll.u32 %s338_s5, 4  ;;  %s151_s11 = int_to_ptr.vmem [resolvable:$true] %s150_s11  ;;  %s153_s14 = int_to_ptr.hbm [resolvable:$true] %s152_s14 }
  0x10   :  { %75 = vst.msk [vmem:[#allocation2] sm:$0xff] %vm74_vm0, %v171_v2  ;;  %v77_v5 = vld [vmem:[#allocation3] sm:$0xff]  ;;  %v115_v7 = vld [vmem:[#allocation8 + $0x10] sm:$0xff]  ;;  %v114_v8 = vld [vmem:[#allocation8 + $0x8] sm:$0xff] }
  0x11   :  { %99 = vmatpush.msra.mxu0 %v80_v1  ;;  %v116_v6 = vld [vmem:[#allocation8 + $0x18] sm:$0xff]  ;;  %v113_v9 = vld [vmem:[#allocation8] sm:$0xff]  ;;  %v172_v15 = vld [vmem:[%s337_s4] ss:$0 sm:$0xff] }
  0x12   :  { %136 = vmatpush.msra.mxu1 %v116_v6 }
  0x13   :  { %100 = vmatpush.msra.mxu0 %v79_v3 }
  0x14   :  { %137 = vmatpush.msra.mxu1 %v115_v7 }
  0x15   :  { %101 = vmatpush.msra.mxu0 %v78_v4 }
  0x16   :  { %163 = vmatmul.msk.f32.vlgmr.msra.gmra.mxu0 %vm74_vm0, %v77_v5  ;;  %138 = vmatpush.msra.mxu1 %v114_v8 }
  0x17   :  { %v76_v10 = vld [vmem:[#allocation2] sm:$0xff] }
  0x18   :  { %139 = vmatpush.msra.mxu1 %v113_v9 }
  0x93   :  { %v103_v11 = vpop.f32.mrf.mxu0 }
  0x94   :  { %v106_v12 = vadd.f32 %v103_v11, %v76_v10 }
  0x96   :  { %107 = vst.msk [vmem:[#allocation2] sm:$0xff] %vm74_vm0, %v106_v12 }
  0x9d   :  { %v111_v13 = vld [vmem:[#allocation2] sm:$0xff] }
  0x9e   :  { %v112_v14 = vmax.f32 %v111_v13, 0.0 }
  0xa0   :  { %164 = vmatmul.msk.f32.vlgmr.msra.gmra.mxu1 %vm74_vm0, %v112_v14 }
 0x11d   :  { %v141_v16 = vpop.f32.mrf.mxu1 }
 0x11e   :  { %v142_v17 = vadd.f32 %v172_v15, %v141_v16 }
 0x120   :  { %144 = vst [vmem:[#allocation9] sm:$0xff] %v142_v17 }
 0x121   :  { %155 = dma.vmem_to_hbm [thread:$0]  %s151_s11, 128, %s153_s14, [#allocation5]  }
 0x122   :  { %273 = dma.done.wait [#allocation5], 128  }
 0x123   :  { %274 = vsyncadd [#allocation5], 4294967168 }
 0x124   :  { %160 = vsyncpa [#allocation4], 1 }
 0x125   :  { %161 = vsyncpa [#allocation7], 1 }
 0x126   :  { %162 = vsyncpa [#allocation5], 1 }

</bundles_post_ra>
